<compile_context>
chip_gen: v6e
topology: v6e:2x2x1
jax: 0.10.0
libtpu: 0.0.40
codegen_flags: <defaults>
</compile_context>

<pallas_src>
import jax
import jax.numpy as jnp
from jax.experimental import pallas as pl
from jax.experimental.pallas import tpu as pltpu

_EPS = 1e-07
_SUB, _LANE = 8, 128
_MAX_ROWS_PER_TILE = 2048   # 2048 * 128 * 4 B = 1 MiB per input block


def _dice_sums_kernel(probs_ref, mask_ref,
                      msum_ref, dot_ref, psum_ref,
                      m_acc, d_acc, p_acc):
    """Accumulate per-(subject, class) partial sums over spatial tiles."""
    k = pl.program_id(2)

    @pl.when(k == 0)
    def _():
        m_acc[0] = jnp.float32(0.0)
        d_acc[0] = jnp.float32(0.0)
        p_acc[0] = jnp.float32(0.0)

    probs = probs_ref[...].astype(jnp.float32)   # (1, 1, T, 128)
    mask = mask_ref[...].astype(jnp.float32)     # (1, 1, T, 128)

    m_acc[0] += jnp.sum(mask)                    # sum(one_mask)
    d_acc[0] += jnp.sum(probs * mask)            # <probs, one_mask>
    p_acc[0] += jnp.sum(probs)                   # sum(probs)

    @pl.when(k == pl.num_programs(2) - 1)
    def _():
        msum_ref[...] = jnp.full(msum_ref.shape, m_acc[0], dtype=jnp.float32)
        dot_ref[...] = jnp.full(dot_ref.shape, d_acc[0], dtype=jnp.float32)
        psum_ref[...] = jnp.full(psum_ref.shape, p_acc[0], dtype=jnp.float32)


def _flatten_lane_dense(x, rows_padded):
    """(N, C, D, H, W) -> zero-padded lane-dense (N, C, rows_padded, 128)."""
    n, c = x.shape[:2]
    flat = x.reshape(n, c, -1)
    pad = rows_padded * _LANE - flat.shape[-1]
    if pad:
        flat = jnp.pad(flat, ((0, 0), (0, 0), (0, pad)))
    return flat.reshape(n, c, rows_padded, _LANE)


def dice_loss_multiclass_3d(output, masks, *, rows_per_tile=None):
    n, c = output.shape[:2]
    flat_len = 1
    for s in output.shape[2:]:
        flat_len *= s

    rows = -(-flat_len // _LANE)                       # ceil(DHW / 128)
    if rows_per_tile is None:
        rows_per_tile = min(-(-rows // _SUB) * _SUB, _MAX_ROWS_PER_TILE)
    assert rows_per_tile % _SUB == 0, "rows_per_tile must be a multiple of 8"
    rows_padded = -(-rows // rows_per_tile) * rows_per_tile
    num_tiles = rows_padded // rows_per_tile

    probs4 = _flatten_lane_dense(output, rows_padded)
    masks4 = _flatten_lane_dense(masks, rows_padded)

    in_spec = pl.BlockSpec((1, 1, rows_per_tile, _LANE),
                           lambda i, j, k: (i, j, k, 0))
    sums_spec = pl.BlockSpec((1, 1, _SUB, _LANE), lambda i, j, k: (i, j, 0, 0))
    sums_shape = jax.ShapeDtypeStruct((n, c, _SUB, _LANE), jnp.float32)

    msum, dot, psum = pl.pallas_call(
        _dice_sums_kernel,
        out_shape=(sums_shape, sums_shape, sums_shape),
        grid_spec=pltpu.PrefetchScalarGridSpec(
            num_scalar_prefetch=0,
            grid=(n, c, num_tiles),
            in_specs=[in_spec, in_spec],
            out_specs=[sums_spec, sums_spec, sums_spec],
            scratch_shapes=[
                pltpu.SMEM((1,), jnp.float32),
                pltpu.SMEM((1,), jnp.float32),
                pltpu.SMEM((1,), jnp.float32),
            ],
        ),
        compiler_params=pltpu.CompilerParams(
            dimension_semantics=("parallel", "parallel", "arbitrary")),
    )(probs4, masks4)

    # Per-(subject, class) combine in plain JAX (cheap: N*C scalars).
    mask_sum = msum[:, :, 0, 0]                       # (N, C)
    prob_sum1 = dot[:, :, 0, 0]                       # <probs, one_mask>
    prob_sum2 = psum[:, :, 0, 0] + mask_sum           # sum(probs + one_mask)

    class_weight = 1.0 / (mask_sum * mask_sum + _EPS)
    nom = jnp.sum(class_weight * prob_sum1, axis=1)
    denom = jnp.sum(class_weight * prob_sum2 + _EPS, axis=1)
    temp_loss = 1.0 - 2.0 * nom / denom               # (N,)
    return jnp.sum(temp_loss, keepdims=True) / n      # shape (1,)


def _ref(output, masks):
    # Pure-JAX reference of the PyTorch forward.
    n, c = output.shape[:2]
    p = output.reshape(n, c, -1).astype(jnp.float32)
    m = masks.reshape(n, c, -1).astype(jnp.float32)
    msum = m.sum(-1)
    w = 1.0 / (msum ** 2 + _EPS)
    nom = (w * (p * m).sum(-1)).sum(-1)
    denom = (w * (p + m).sum(-1) + _EPS).sum(-1)
    temp = 1.0 - 2.0 * nom / denom
    return jnp.sum(temp, keepdims=True) / n


if __name__ == "__main__":
    key = jax.random.PRNGKey(0)
    k1, k2, k3, k4 = jax.random.split(key, 4)

    # Case 1: basic small shape (single spatial tile, no padding).
    N, C, D, H, W = 2, 4, 4, 16, 16
    output = jax.random.uniform(k1, (N, C, D, H, W), dtype=jnp.float32)
    masks = (jax.random.uniform(k2, (N, C, D, H, W)) < 0.3).astype(jnp.float32)
    loss = jax.block_until_ready(dice_loss_multiclass_3d(output, masks))
    ref = _ref(output, masks)
    assert loss.shape == (1,)
    assert jnp.allclose(loss, ref, rtol=1e-5, atol=1e-6), (loss, ref)

    # Case 2: exercises zero padding + multi-tile SMEM accumulation.
    N2, C2, D2, H2, W2 = 2, 3, 4, 16, 20   # flat = 1280 -> 10 rows of 128
    out2 = jax.random.uniform(k3, (N2, C2, D2, H2, W2), dtype=jnp.float32)
    msk2 = (jax.random.uniform(k4, (N2, C2, D2, H2, W2)) < 0.4).astype(jnp.float32)
    loss2 = jax.block_until_ready(
        dice_loss_multiclass_3d(out2, msk2, rows_per_tile=8))  # -> 2 tiles
    ref2 = _ref(out2, msk2)
    assert loss2.shape == (1,)
    assert jnp.allclose(loss2, ref2, rtol=1e-5, atol=1e-6), (loss2, ref2)

    print("KERNEL_OK")
</pallas_src>

<mosaic_0001>
module attributes {stable_mosaic.version = 11 : i64} {
  func.func @_dice_sums_kernel(%arg0: i32, %arg1: i32, %arg2: i32, %arg3: memref<1x1x8x128xf32, #tpu.memory_space<vmem>>, %arg4: memref<1x1x8x128xf32, #tpu.memory_space<vmem>>, %arg5: memref<1x1x8x128xf32, #tpu.memory_space<vmem>>, %arg6: memref<1x1x8x128xf32, #tpu.memory_space<vmem>>, %arg7: memref<1x1x8x128xf32, #tpu.memory_space<vmem>>, %arg8: memref<1xf32, #tpu.memory_space<smem>>, %arg9: memref<1xf32, #tpu.memory_space<smem>>, %arg10: memref<1xf32, #tpu.memory_space<smem>>) attributes {dimension_semantics = [#tpu.dimension_semantics<parallel>, #tpu.dimension_semantics<parallel>, #tpu.dimension_semantics<arbitrary>], iteration_bounds = array<i64: 2, 4, 1>, scalar_prefetch = 0 : i64, scratch_operands = 3 : i64, tpu.core_type = #tpu.core_type<tc>, window_params = [{transform_indices = @transform_0, window_bounds = array<i64: 1, 1, 8, 128>}, {transform_indices = @transform_1, window_bounds = array<i64: 1, 1, 8, 128>}, {transform_indices = @transform_2, window_bounds = array<i64: 1, 1, 8, 128>}, {transform_indices = @transform_3, window_bounds = array<i64: 1, 1, 8, 128>}, {transform_indices = @transform_4, window_bounds = array<i64: 1, 1, 8, 128>}]} {
    %c0_i32 = arith.constant 0 : i32
    %0 = arith.cmpi eq, %arg2, %c0_i32 : i32
    %1 = arith.extui %0 : i1 to i32
    %c0_i32_0 = arith.constant 0 : i32
    %2 = arith.cmpi ne, %1, %c0_i32_0 : i32
    scf.if %2 {
      %cst_18 = arith.constant 0.000000e+00 : f32
      %c0_19 = arith.constant 0 : index
      %30 = memref.load %arg8[%c0_19] : memref<1xf32, #tpu.memory_space<smem>>
      memref.store %cst_18, %arg8[%c0_19] : memref<1xf32, #tpu.memory_space<smem>>
      %cst_20 = arith.constant 0.000000e+00 : f32
      %c0_21 = arith.constant 0 : index
      %31 = memref.load %arg9[%c0_21] : memref<1xf32, #tpu.memory_space<smem>>
      memref.store %cst_20, %arg9[%c0_21] : memref<1xf32, #tpu.memory_space<smem>>
      %cst_22 = arith.constant 0.000000e+00 : f32
      %c0_23 = arith.constant 0 : index
      %32 = memref.load %arg10[%c0_23] : memref<1xf32, #tpu.memory_space<smem>>
      memref.store %cst_22, %arg10[%c0_23] : memref<1xf32, #tpu.memory_space<smem>>
    } else {
    }
    %c0 = arith.constant 0 : index
    %c0_1 = arith.constant 0 : index
    %c0_2 = arith.constant 0 : index
    %c0_3 = arith.constant 0 : index
    %3 = vector.load %arg3[%c0, %c0_1, %c0_2, %c0_3] : memref<1x1x8x128xf32, #tpu.memory_space<vmem>>, vector<1x1x8x128xf32>
    %c0_4 = arith.constant 0 : index
    %c0_5 = arith.constant 0 : index
    %c0_6 = arith.constant 0 : index
    %c0_7 = arith.constant 0 : index
    %4 = vector.load %arg4[%c0_4, %c0_5, %c0_6, %c0_7] : memref<1x1x8x128xf32, #tpu.memory_space<vmem>>, vector<1x1x8x128xf32>
    %c0_8 = arith.constant 0 : index
    %5 = memref.load %arg8[%c0_8] : memref<1xf32, #tpu.memory_space<smem>>
    %6 = vector.shape_cast %4 : vector<1x1x8x128xf32> to vector<1x1x1x8x128xf32>
    %cst = arith.constant dense<0.000000e+00> : vector<1xf32>
    %7 = vector.multi_reduction <add>, %6, %cst [1, 2, 3, 4] : vector<1x1x1x8x128xf32> to vector<1xf32>
    %8 = vector.shape_cast %7 : vector<1xf32> to vector<1x1x1x1x1xf32>
    %9 = vector.extract %8[0, 0, 0, 0, 0] : f32 from vector<1x1x1x1x1xf32>
    %10 = arith.addf %5, %9 : f32
    %c0_9 = arith.constant 0 : index
    %11 = memref.load %arg8[%c0_9] : memref<1xf32, #tpu.memory_space<smem>>
    memref.store %10, %arg8[%c0_9] : memref<1xf32, #tpu.memory_space<smem>>
    %c0_10 = arith.constant 0 : index
    %12 = memref.load %arg9[%c0_10] : memref<1xf32, #tpu.memory_space<smem>>
    %13 = arith.mulf %3, %4 : vector<1x1x8x128xf32>
    %14 = vector.shape_cast %13 : vector<1x1x8x128xf32> to vector<1x1x1x8x128xf32>
    %cst_11 = arith.constant dense<0.000000e+00> : vector<1xf32>
    %15 = vector.multi_reduction <add>, %14, %cst_11 [1, 2, 3, 4] : vector<1x1x1x8x128xf32> to vector<1xf32>
    %16 = vector.shape_cast %15 : vector<1xf32> to vector<1x1x1x1x1xf32>
    %17 = vector.extract %16[0, 0, 0, 0, 0] : f32 from vector<1x1x1x1x1xf32>
    %18 = arith.addf %12, %17 : f32
    %c0_12 = arith.constant 0 : index
    %19 = memref.load %arg9[%c0_12] : memref<1xf32, #tpu.memory_space<smem>>
    memref.store %18, %arg9[%c0_12] : memref<1xf32, #tpu.memory_space<smem>>
    %c0_13 = arith.constant 0 : index
    %20 = memref.load %arg10[%c0_13] : memref<1xf32, #tpu.memory_space<smem>>
    %21 = vector.shape_cast %3 : vector<1x1x8x128xf32> to vector<1x1x1x8x128xf32>
    %cst_14 = arith.constant dense<0.000000e+00> : vector<1xf32>
    %22 = vector.multi_reduction <add>, %21, %cst_14 [1, 2, 3, 4] : vector<1x1x1x8x128xf32> to vector<1xf32>
    %23 = vector.shape_cast %22 : vector<1xf32> to vector<1x1x1x1x1xf32>
    %24 = vector.extract %23[0, 0, 0, 0, 0] : f32 from vector<1x1x1x1x1xf32>
    %25 = arith.addf %20, %24 : f32
    %c0_15 = arith.constant 0 : index
    %26 = memref.load %arg10[%c0_15] : memref<1xf32, #tpu.memory_space<smem>>
    memref.store %25, %arg10[%c0_15] : memref<1xf32, #tpu.memory_space<smem>>
    %c0_i32_16 = arith.constant 0 : i32
    %27 = arith.cmpi eq, %arg2, %c0_i32_16 : i32
    %28 = arith.extui %27 : i1 to i32
    %c0_i32_17 = arith.constant 0 : i32
    %29 = arith.cmpi ne, %28, %c0_i32_17 : i32
    scf.if %29 {
      %c0_18 = arith.constant 0 : index
      %30 = memref.load %arg8[%c0_18] : memref<1xf32, #tpu.memory_space<smem>>
      %31 = vector.broadcast %30 : f32 to vector<1x1x8x128xf32>
      %c0_19 = arith.constant 0 : index
      %c0_20 = arith.constant 0 : index
      %c0_21 = arith.constant 0 : index
      %c0_22 = arith.constant 0 : index
      %32 = vector.load %arg5[%c0_19, %c0_20, %c0_21, %c0_22] : memref<1x1x8x128xf32, #tpu.memory_space<vmem>>, vector<1x1x8x128xf32>
      tpu.vector_store %arg5[%c0_19, %c0_20, %c0_21, %c0_22], %31 {strides = array<i32>} : memref<1x1x8x128xf32, #tpu.memory_space<vmem>>, vector<1x1x8x128xf32>,
      %c0_23 = arith.constant 0 : index
      %33 = memref.load %arg9[%c0_23] : memref<1xf32, #tpu.memory_space<smem>>
      %34 = vector.broadcast %33 : f32 to vector<1x1x8x128xf32>
      %c0_24 = arith.constant 0 : index
      %c0_25 = arith.constant 0 : index
      %c0_26 = arith.constant 0 : index
      %c0_27 = arith.constant 0 : index
      %35 = vector.load %arg6[%c0_24, %c0_25, %c0_26, %c0_27] : memref<1x1x8x128xf32, #tpu.memory_space<vmem>>, vector<1x1x8x128xf32>
      tpu.vector_store %arg6[%c0_24, %c0_25, %c0_26, %c0_27], %34 {strides = array<i32>} : memref<1x1x8x128xf32, #tpu.memory_space<vmem>>, vector<1x1x8x128xf32>,
      %c0_28 = arith.constant 0 : index
      %36 = memref.load %arg10[%c0_28] : memref<1xf32, #tpu.memory_space<smem>>
      %37 = vector.broadcast %36 : f32 to vector<1x1x8x128xf32>
      %c0_29 = arith.constant 0 : index
      %c0_30 = arith.constant 0 : index
      %c0_31 = arith.constant 0 : index
      %c0_32 = arith.constant 0 : index
      %38 = vector.load %arg7[%c0_29, %c0_30, %c0_31, %c0_32] : memref<1x1x8x128xf32, #tpu.memory_space<vmem>>, vector<1x1x8x128xf32>
      tpu.vector_store %arg7[%c0_29, %c0_30, %c0_31, %c0_32], %37 {strides = array<i32>} : memref<1x1x8x128xf32, #tpu.memory_space<vmem>>, vector<1x1x8x128xf32>,
    } else {
    }
    return
  }
  func.func @transform_0(%arg0: i32, %arg1: i32, %arg2: i32) -> (i32, i32, i32, i32) {
    %c0_i32 = arith.constant 0 : i32
    %c0_i32_0 = arith.constant 0 : i32
    return %arg0, %arg1, %arg2, %c0_i32 : i32, i32, i32, i32
  }
  func.func @transform_1(%arg0: i32, %arg1: i32, %arg2: i32) -> (i32, i32, i32, i32) {
    %c0_i32 = arith.constant 0 : i32
    %c0_i32_0 = arith.constant 0 : i32
    return %arg0, %arg1, %arg2, %c0_i32 : i32, i32, i32, i32
  }
  func.func @transform_2(%arg0: i32, %arg1: i32, %arg2: i32) -> (i32, i32, i32, i32) {
    %c0_i32 = arith.constant 0 : i32
    %c0_i32_0 = arith.constant 0 : i32
    %c0_i32_1 = arith.constant 0 : i32
    return %arg0, %arg1, %c0_i32, %c0_i32_0 : i32, i32, i32, i32
  }
  func.func @transform_3(%arg0: i32, %arg1: i32, %arg2: i32) -> (i32, i32, i32, i32) {
    %c0_i32 = arith.constant 0 : i32
    %c0_i32_0 = arith.constant 0 : i32
    %c0_i32_1 = arith.constant 0 : i32
    return %arg0, %arg1, %c0_i32, %c0_i32_0 : i32, i32, i32, i32
  }
  func.func @transform_4(%arg0: i32, %arg1: i32, %arg2: i32) -> (i32, i32, i32, i32) {
    %c0_i32 = arith.constant 0 : i32
    %c0_i32_0 = arith.constant 0 : i32
    %c0_i32_1 = arith.constant 0 : i32
    return %arg0, %arg1, %c0_i32, %c0_i32_0 : i32, i32, i32, i32
  }
}

</mosaic_0001>

<bundles_post_ra>
// kernel: tpu_custom_call.1
= control target key start
LH: loop header
LB: loop body
LE: loop exit
PB: predicated region body
PF: predicated region fallthrough
CT: control target
= control target key end

     0   :  { %s1268_s0 = inlined_call_operand.hbm [shape: f32[2,4,8,128], index: 0, kind: input, shape index: {}]   ;;  %s1269_s1 = inlined_call_operand.hbm [shape: f32[2,4,8,128], index: 1, kind: input, shape index: {}]   ;;  %s1270_s2 = inlined_call_operand.hbm [shape: f32[2,4,8,128], index: 2, kind: output, shape index: {0}]   ;;  %s1271_s3 = inlined_call_operand.hbm [shape: f32[2,4,8,128], index: 3, kind: output, shape index: {1}]   ;;  %s1272_s4 = inlined_call_operand.hbm [shape: f32[2,4,8,128], index: 4, kind: output, shape index: {2}]  }
   0x1   :  { %1278 = sst [smem:[#allocation21_spill]] %s1268_s0 }
   0x2   :  { %10 = vsyncpa [#allocation6], 0 }
   0x3   :  { %12 = vsyncpa [#allocation6 + $0x1], 0 }
   0x4   :  { %13 = vsyncpa [#allocation9], 0 }
   0x5   :  { %15 = vsyncpa [#allocation9 + $0x1], 0 }
   0x6   :  { %16 = vsyncpa [#allocation7], 0 }
   0x7   :  { %18 = vsyncpa [#allocation7 + $0x1], 0 }
   0x8   :  { %19 = vsyncpa [#allocation12], 0 }
   0x9   :  { %21 = vsyncpa [#allocation12 + $0x1], 0  ;;  %s977_s15 = smov 0   ;;  %s979_s16 = smov 0  }
   0xa   :  { %s981_s17 = smov 0   ;;  %s983_s18 = smov 0  }
   0xb   :  { %s985_s19 = smov 0   ;;  %s987_s20 = smov 0  }
   0xc   :  { %s989_s21 = smov 0   ;;  %s991_s22 = smov 0  }
   0xd LB: > { %1279 = sst [smem:[#allocation18_spill]] %s941_s21  ;;  %s1018_s23 = sadd.s32 4294967295, %s945_s22   ;;  %s945_s22 = sphi %s991_s22, %s27_s22   ;;  %s941_s21 = sphi %s989_s21, %s1294_s21   ;;  %s937_s20 = sphi %s987_s20, %s1299_s20   ;;  %s933_s19 = sphi %s985_s19, %s1292_s19   ;;  %s929_s18 = sphi %s983_s18, %s1298_s18   ;;  %s925_s17 = sphi %s981_s17, %s1297_s17   ;;  %s921_s16 = sphi %s979_s16, %s1296_s16   ;;  %s917_s15 = sphi %s977_s15, %s1295_s15  }
   0xe   : > { %s1273_s24 = sadd.s32 4294967294, %s945_s22   ;;  %s42_s25 = sadd.s32 1, %s937_s20 }
   0xf   : > { %s46_s26 = sadd.s32 1, %s941_s21  ;;  %p44_p0 = scmp.ge.s32.totalorder %s42_s25, 4 }
  0x10   : > { %s57_s27 = sadd.s32 1, %s925_s17  ;;  %p64_p1 = scmp.ne.s32.totalorder %s925_s17, %s921_s16 }
  0x11   : > { %p65_p2 = scmp.eq.s32.totalorder %s945_s22, 0  ;;  %s1301_s25 = smov (%p44_p0, %s42_s25), 0 }
  0x12   : > { %1280 = sst [smem:[#allocation19_spill]] %s1301_s25  ;;  %s1303_s26 = smov (!%p44_p0, %s46_s26), %s941_s21 }
  0x13   : > { %s51_s28 = ssub.s32 %s937_s20, %s1301_s25  ;;  %p1032_p3 = por %p65_p2, %p64_p1 }
  0x14   : > { %p48_p4 = scmp.ge.s32.totalorder %s1303_s26, 2  ;;  %p70_p5 = scmp.ne.s32.totalorder %s921_s16, %s917_s15 }
  0x15   : > { %p71_p6 = scmp.eq.s32.totalorder %s1018_s23, 0  ;;  %p126_p7 = scmp.eq.s32.totalorder %s1018_s23, 7 }
  0x16   : > { %s1305_s26 = smov (%p48_p4, %s1303_s26), 0  ;;  %p132_p10 = scmp.eq.s32.totalorder %s1273_s24, 7 }
  0x17   : > { %1282 = sst [smem:[#allocation20_spill]] %s1305_s26  ;;  %p1042_p8 = por %p71_p6, %p70_p5 }
  0x18   : > { %p1046_p9 = por %p126_p7, %p64_p1  ;;  %s50_s6 = ssub.s32 %s941_s21, %s1305_s26 }
  0x19   : > { %s52_s7 = sor.u32 %s51_s28, %s50_s6  ;;  %p1054_p12 = por %p132_p10, %p70_p5 }
  0x1a   : > { %p55_p11 = scmp.eq.s32.totalorder %s52_s7, 0  ;;  %p667_p13 = scmp.lt.s32.totalorder %s945_s22, 8 }
  0x1b   : > { %s1060_s9 = sand.u32 1, %s925_s17   ;;  %s612_s12 = sshll.u32 %s941_s21, 2 }
  0x1c   : > { %s1063_s10 = scalar_select %p55_p11, %s925_s17, %s57_s27  }
  0x1d   : > { %s611_s11 = sshll.u32 %s1060_s9, 3  ;;  %s218_s13 = sadd.s32 %s937_s20, %s612_s12 }
  0x1e   : > { %s212_s14 = scalar_lea.vmem [#allocation5], %s611_s11  ;;  %s613_s6 = sshll.u32 %s218_s13, 7 }
  0x1f   : > { %s222_s28 = sshll.u32 %s212_s14, 4  ;;  %s1286_s0 = sld [smem:[#allocation21_spill]]  ;;  %s223_s28 = int_to_ptr.vmem [resolvable:$true] %s222_s28 }
  0x20   : > { %p1075_p0 = pnand %p667_p13, %p1032_p3  ;;  %p617_p1 = scmp.ge.s32.totalorder %s945_s22, 1 }
  0x21   : > { %p248_p2 = scmp.lt.s32.totalorder %s945_s22, 9  ;;  %s209_s27 = scalar_lea.sflag [#allocation6], %s1060_s9 }
  0x22   : > { %p735_p4 = pneg %p1075_p0  ;;  %s746_s12 = scalar_lea.vmem %s223_s28, 128 }
  0x23   : > { %p747_p5 = scmp.ne.s32.totalorder %s223_s28, %s746_s12  ;;  %s947_s24 = smov [#allocation5]  }
  0x24   : > { %s751_s13 = sshll.u32 %s947_s24, 4  ;;  %s752_s13 = int_to_ptr.vmem [resolvable:$false] %s751_s13 }
  0x25   : > { %s220_s26 = scalar_lea.hbm %s1286_s0, %s613_s6  ;;  %p749_p6 = pnand %p747_p5, %p735_p4 }
  0x26   : > { %s753_s29 = scalar_lea.vmem %s752_s13, 256  ;;  %p754_p3 = scmp.lt.s32.totalorder %s223_s28, %s752_s13 }
  0x27   : > { %p750_p7 = pneg %p749_p6  ;;  %p755_p10 = scmp.lt.s32.totalorder %s753_s29, %s746_s12 }
  0x29   : > { %p756_p11 = por %p755_p10, %p754_p3 }
  0x2b   : > { %p757_p13 = pnand %p756_p11, %p750_p7 }
  0x2d   : > { %760 = shalt.err (!%p757_p13)
}
  0x2e   : > { %653 = dma.hbm_to_vmem [thread:$0]  (!%p1075_p0), %s220_s26, 128, %s223_s28, %s209_s27  }
  0x2f   : > { %p1093_p5 = pnand %p617_p1, %p248_p2  ;;  %s241_s12 = scalar_lea.hbm %s1269_s1, %s613_s6 }
  0x30   : > { %s233_s13 = scalar_lea.vmem [#allocation8], %s611_s11  ;;  %s230_s0 = scalar_lea.sflag [#allocation9], %s1060_s9 }
  0x31   : > { %s243_s29 = sshll.u32 %s233_s13, 4  ;;  %s948_s26 = smov [#allocation8]   ;;  %s244_s29 = int_to_ptr.vmem [resolvable:$true] %s243_s29 }
  0x32   : > { %s774_s21 = scalar_lea.vmem %s244_s29, 128  ;;  %s779_s28 = sshll.u32 %s948_s26, 4  ;;  %s780_s28 = int_to_ptr.vmem [resolvable:$false] %s779_s28 }
  0x33   : > { %p775_p6 = scmp.ne.s32.totalorder %s244_s29, %s774_s21  ;;  %s781_s27 = scalar_lea.vmem %s780_s28, 256 }
  0x34   : > { %p782_p1 = scmp.lt.s32.totalorder %s244_s29, %s780_s28  ;;  %p783_p2 = scmp.lt.s32.totalorder %s781_s27, %s774_s21 }
  0x35   : > { %p777_p7 = pnand %p775_p6, %p735_p4 }
  0x36   : > { %p784_p10 = por %p783_p2, %p782_p1 }
  0x37   : > { %p778_p3 = pneg %p777_p7 }
  0x39   : > { %p785_p11 = pnand %p784_p10, %p778_p3 }
  0x3b   : > { %788 = shalt.err (!%p785_p11)
}
  0x3c   : > { %656 = dma.hbm_to_vmem [thread:$0]  (!%p1075_p0), %s241_s12, 128, %s244_s29, %s230_s0  }
  0x3d   : > { %252 = sbr.rel (%p1093_p5) target bundleno = 336 (0x150), region = 28  ;;  %s1111_s9 = sand.u32 (!%p1093_p5), 1, %s921_s16  }
  0x3e   : > { %s1114_s11 = sshll.u32 (!%p1093_p5), %s1111_s9, 3  ;;  %s255_s6 = scalar_lea.sflag (!%p1093_p5), [#allocation6], %s1111_s9 }
  0x3f   : > { %s258_s21 = scalar_lea.vmem (!%p1093_p5), [#allocation5], %s1114_s11 }
  0x42   : > { %900 = dma.done.wait (%p1042_p8), %s255_s6, 128  }
  0x43   : > { %902 = vsyncadd (%p1042_p8), %s255_s6, 4294967168  ;;  %s264_s0 = scalar_lea.sflag [#allocation9], %s1111_s9  ;;  %s267_s25 = scalar_lea.vmem [#allocation8], %s1114_s11 }
  0x44   : > { %904 = dma.done.wait (%p1042_p8), %s264_s0, 128  }
  0x45   : > { %906 = vsyncadd (%p1042_p8), %s264_s0, 4294967168  ;;  %v318_v0 = vld [vmem:[%s267_s25] sm:$0xff]  ;;  %v317_v1 = vld [vmem:[%s258_s21] sm:$0xff]  ;;  %s626_s30 = sshll.u32 %s933_s19, 2  ;;  %s292_s24 = scalar_lea.vmem [#allocation10], %s1114_s11 }
  0x46   : > { %320 = vadd.xlane.f32.xlu0 %v318_v0  ;;  %347 = vadd.xlane.f32.xlu1 %v317_v1  ;;  %v333_v2 = vmul.f32 %v318_v0, %v317_v1  ;;  %s393_s14 = sadd.s32 %s929_s18, %s626_s30  ;;  %s397_s12 = sshll.u32 %s292_s24, 4  ;;  %s1143_s12 = int_to_ptr.vmem [resolvable:$true] %s397_s12 }
  0x47   : > { %s1130_s7 = sshll.u32 %s393_s14, 7  ;;  %s1277_s13 = scalar_lea.vmem [#allocation13], %s1114_s11 }
  0x48   : > { %s427_s29 = sshll.u32 %s1277_s13, 4  ;;  %s1141_s6 = scalar_lea.hbm %s1270_s2, %s1130_s7  ;;  %s1150_s29 = int_to_ptr.vmem [resolvable:$true] %s427_s29 }
  0x49   : > { %s299_s18 = scalar_lea.vmem [#allocation11], %s1114_s11  ;;  %s1156_s30 = scalar_lea.hbm %s1271_s3, %s1130_s7 }
  0x4a   : > { %334 = vadd.xlane.f32.xlu0 %v333_v2  ;;  %s1148_s19 = sshll.u32 %s299_s18, 4  ;;  %s372_s14 = scalar_lea.sflag [#allocation7], %s1111_s9  ;;  %s1180_s19 = int_to_ptr.vmem [resolvable:$true] %s1148_s19 }
  0x4b   : > { %s789_s28 = scalar_lea.vmem %s1143_s12, 128  ;;  %s949_s27 = smov [#allocation10]  }
  0x4c   : > { %p790_p8 = scmp.ne.s32.totalorder %s1143_s12, %s789_s28 }
  0x4e   : > { %p791_p0 = pnand %p790_p8, %p1046_p9 }
  0x50   : > { %p792_p4 = pneg %p791_p0 }
  0xcf   : > { %v321_v3 = vpop.xlane.xlu0 %320  ;;  %v348_v4 = vpop.xlane.xlu1 %347 }
  0xd0   : > { %v322_v5 = vrot.slane %v321_v3, 4  ;;  %v349_v6 = vrot.slane %v348_v4, 4 }
  0xd2   : > { %v323_v7 = vadd.f32 %v322_v5, %v321_v3  ;;  %v350_v8 = vadd.f32 %v349_v6, %v348_v4 }
  0xd3   : > { %v335_v9 = vpop.xlane.xlu0 %334 }
  0xd4   : > { %v324_v10 = vrot.slane %v323_v7, 2  ;;  %v351_v11 = vrot.slane %v350_v8, 2  ;;  %v336_v12 = vrot.slane %v335_v9, 4 }
  0xd6   : > { %v337_v13 = vadd.f32 %v336_v12, %v335_v9  ;;  %v325_v14 = vadd.f32 %v324_v10, %v323_v7  ;;  %v352_v15 = vadd.f32 %v351_v11, %v350_v8 }
  0xd8   : > { %v338_v16 = vrot.slane %v337_v13, 2  ;;  %v326_v17 = vrot.slane %v325_v14, 1  ;;  %v353_v20 = vrot.slane %v352_v15, 1 }
  0xda   : > { %v339_v18 = vadd.f32 %v338_v16, %v337_v13  ;;  %v327_v19 = vadd.f32 %v326_v17, %v325_v14  ;;  %v354_v23 = vadd.f32 %v353_v20, %v352_v15 }
  0xdc   : > { %634 = vpush %v327_v19  ;;  %v340_v21 = vrot.slane %v339_v18, 1 }
  0xde   : > { %v341_v22 = vadd.f32 %v340_v21, %v339_v18 }
  0xe0   : > { %636 = vpush %v341_v22 }
  0xe1   : > { %638 = vpush %v354_v23 }
 0x10d   : > { %s635_s21 = spop %634 }
 0x10e   : > { %v363_v24 = vstv %s635_s21  ;;  %s793_s21 = sshll.u32 %s949_s27, 4  ;;  %s794_s21 = int_to_ptr.vmem [resolvable:$false] %s793_s21 }
 0x10f   : > { %364 = vst [vmem:[%s292_s24] sm:$0xff] %v363_v24  ;;  %s795_s26 = scalar_lea.vmem %s794_s21, 256  ;;  %p796_p13 = scmp.lt.s32.totalorder %s1143_s12, %s794_s21 }
 0x110   : > { %p797_p5 = scmp.lt.s32.totalorder %s795_s26, %s789_s28 }
 0x112   : > { %p798_p6 = por %p797_p5, %p796_p13 }
 0x114   : > { %p799_p7 = pnand %p798_p6, %p792_p4 }
 0x116   : > { %802 = shalt.err (!%p799_p7)
}
 0x117   : > { %s803_s24 = scalar_lea.hbm %s1141_s6, 128  ;;  %s807_s25 = scalar_lea.hbm %s1270_s2, 1024 }
 0x118   : > { %p804_p3 = scmp.ne.s32.totalorder %s1141_s6, %s803_s24  ;;  %p808_p10 = scmp.lt.s32.totalorder %s1141_s6, %s1270_s2 }
 0x119   : > { %p809_p11 = scmp.lt.s32.totalorder %s807_s25, %s803_s24 }
 0x11a   : > { %p805_p1 = pnand %p804_p3, %p1046_p9 }
 0x11b   : > { %p810_p8 = por %p809_p11, %p808_p10 }
 0x11c   : > { %p806_p2 = pneg %p805_p1 }
 0x11e   : > { %p811_p0 = pnand %p810_p8, %p806_p2 }
 0x120   : > { %814 = shalt.err (!%p811_p0)
}
 0x121   : > { %644 = dma.vmem_to_hbm [thread:$0]  (%p1046_p9), %s1143_s12, 128, %s1141_s6, %s372_s14  }
 0x122   : > { %s637_s26 = spop %636  ;;  %s1186_s24 = scalar_lea.hbm %s1272_s4, %s1130_s7 }
 0x123   : > { %v366_v25 = vstv %s637_s26  ;;  %s639_s13 = spop %638  ;;  %s1289_s9 = scalar_lea.vmem [#allocation13], %s1114_s11 }
 0x124   : > { %367 = vst [vmem:[%s299_s18] sm:$0xff] %v366_v25  ;;  %v369_v26 = vstv %s639_s13  ;;  %s1290_s0 = sand.u32 1, %s1018_s23   ;;  %s815_s6 = scalar_lea.vmem %s1180_s19, 128 }
 0x125   : > { %370 = vst [vmem:[%s1289_s9] sm:$0xff] %v369_v26  ;;  %s1194_s12 = scalar_lea.sflag [#allocation12], %s1290_s0  ;;  %p816_p4 = scmp.ne.s32.totalorder %s1180_s19, %s815_s6 }
 0x126   : > { %s950_s14 = smov [#allocation11]  }
 0x127   : > { %p817_p13 = pnand %p816_p4, %p1046_p9  ;;  %s819_s25 = sshll.u32 %s950_s14, 4  ;;  %s820_s25 = int_to_ptr.vmem [resolvable:$false] %s819_s25 }
 0x128   : > { %s821_s27 = scalar_lea.vmem %s820_s25, 256  ;;  %p822_p6 = scmp.lt.s32.totalorder %s1180_s19, %s820_s25 }
 0x129   : > { %p818_p5 = pneg %p817_p13  ;;  %p823_p7 = scmp.lt.s32.totalorder %s821_s27, %s815_s6 }
 0x12b   : > { %p824_p3 = por %p823_p7, %p822_p6 }
 0x12d   : > { %p825_p1 = pnand %p824_p3, %p818_p5 }
 0x12f   : > { %828 = shalt.err (!%p825_p1)
}
 0x130   : > { %s829_s23 = scalar_lea.hbm %s1156_s30, 128  ;;  %s833_s18 = scalar_lea.hbm %s1271_s3, 1024 }
 0x131   : > { %p830_p2 = scmp.ne.s32.totalorder %s1156_s30, %s829_s23  ;;  %p834_p8 = scmp.lt.s32.totalorder %s1156_s30, %s1271_s3 }
 0x132   : > { %p835_p0 = scmp.lt.s32.totalorder %s833_s18, %s829_s23 }
 0x133   : > { %p831_p10 = pnand %p830_p2, %p1046_p9 }
 0x134   : > { %p836_p4 = por %p835_p0, %p834_p8 }
 0x135   : > { %p832_p11 = pneg %p831_p10 }
 0x137   : > { %p837_p13 = pnand %p836_p4, %p832_p11 }
 0x139   : > { %840 = shalt.err (!%p837_p13)
}
 0x13a   : > { %645 = dma.vmem_to_hbm [thread:$0]  (%p1046_p9), %s1180_s19, 128, %s1156_s30, %s1194_s12  }
 0x13b   : > { %s841_s28 = scalar_lea.vmem %s1150_s29, 128  ;;  %s951_s21 = smov [#allocation13]  }
 0x13c   : > { %p842_p5 = scmp.ne.s32.totalorder %s1150_s29, %s841_s28  ;;  %s845_s9 = sshll.u32 %s951_s21, 4  ;;  %s846_s9 = int_to_ptr.vmem [resolvable:$false] %s845_s9 }
 0x13d   : > { %s847_s0 = scalar_lea.vmem %s846_s9, 256  ;;  %p848_p3 = scmp.lt.s32.totalorder %s1150_s29, %s846_s9 }
 0x13e   : > { %p843_p6 = pnand %p842_p5, %p1046_p9  ;;  %p849_p1 = scmp.lt.s32.totalorder %s847_s0, %s841_s28 }
 0x140   : > { %p844_p7 = pneg %p843_p6  ;;  %p850_p2 = por %p849_p1, %p848_p3 }
 0x142   : > { %p851_p10 = pnand %p850_p2, %p844_p7 }
 0x144   : > { %854 = shalt.err (!%p851_p10)
}
 0x145   : > { %s855_s6 = scalar_lea.hbm %s1186_s24, 128  ;;  %s859_s14 = scalar_lea.hbm %s1272_s4, 1024 }
 0x146   : > { %p856_p11 = scmp.ne.s32.totalorder %s1186_s24, %s855_s6  ;;  %p860_p4 = scmp.lt.s32.totalorder %s1186_s24, %s1272_s4 }
 0x147   : > { %p861_p13 = scmp.lt.s32.totalorder %s859_s14, %s855_s6 }
 0x148   : > { %p857_p8 = pnand %p856_p11, %p1046_p9 }
 0x149   : > { %p862_p5 = por %p861_p13, %p860_p4 }
 0x14a   : > { %p858_p0 = pneg %p857_p8 }
 0x14c   : > { %p863_p6 = pnand %p862_p5, %p858_p0 }
 0x14e   : > { %866 = shalt.err (!%p863_p6)
}
 0x14f   : > { %646 = dma.vmem_to_hbm [thread:$0]  (%p1046_p9), %s1150_s29, 128, %s1186_s24, %s1194_s12  }
 0x150 PF: > { %p668_p7 = scmp.ge.s32.totalorder %s945_s22, 2  ;;  %s439_s23 = sand.u32 1, %s917_s15  }
 0x151   : > { %s440_s11 = scalar_lea.sflag [#allocation7], %s439_s23 }
 0x152   : > { %p658_p3 = pnand %p668_p7, %p1054_p12 }
 0x154   : > { %p659_p1 = pneg %p658_p3 }
 0x156   : > { %908 = dma.done.wait (%p659_p1), %s440_s11, 128  }
 0x157   : > { %910 = vsyncadd (%p659_p1), %s440_s11, 4294967168  ;;  %s1291_s7 = sadd.s32 4294967294, %s945_s22  }
 0x158   : > { %s448_s18 = sand.u32 1, %s1291_s7  }
 0x159   : > { %s449_s5 = scalar_lea.sflag [#allocation12], %s448_s18 }
 0x15a   : > { %912 = dma.done.wait (%p659_p1), %s449_s5, 256  }
 0x15b   : > { %914 = vsyncadd (%p659_p1), %s449_s5, 4294967040  ;;  %s27_s22 = sadd.s32 1, %s945_s22   ;;  %s1292_s19 = sld [smem:[#allocation18_spill]] }
 0x15c   : > { %p24_p9 = scmp.ge.s32.totalorder %s27_s22, 10   ;;  %s1293_s8 = sld [smem:[#allocation19_spill]] }
 0x15d   : > { %s1294_s21 = sld [smem:[#allocation20_spill]]  ;;  %s1295_s15 = smov %s921_s16 }
 0x15e   : > { %s1296_s16 = smov %s925_s17  ;;  %s1297_s17 = smov %s1063_s10 }
 0x15f   : > { %s1298_s18 = smov %s937_s20  ;;  %26 = sbr.rel (!%p24_p9) target bundleno = 13 (0xd), region = 132 }
 0x162   : > { %s1299_s20 = smov %s1293_s8 }
 0x164   :  { %463 = vsyncpa [#allocation6], 1 }
 0x165   :  { %465 = vsyncpa [#allocation6 + $0x1], 1 }
 0x166   :  { %466 = vsyncpa [#allocation9], 1 }
 0x167   :  { %468 = vsyncpa [#allocation9 + $0x1], 1 }
 0x168   :  { %469 = vsyncpa [#allocation7], 1 }
 0x169   :  { %471 = vsyncpa [#allocation7 + $0x1], 1 }
 0x16a   :  { %472 = vsyncpa [#allocation12], 1 }
 0x16b   :  { %474 = vsyncpa [#allocation12 + $0x1], 1 }

</bundles_post_ra>
